<compile_context>
chip_gen: v7x
topology: tpu7x:2x2x1
jax: 0.10.0
libtpu: 0.0.40
codegen_flags: <defaults>
</compile_context>

<pallas_src>
import math
import functools

import jax
import jax.numpy as jnp
from jax.experimental import pallas as pl
from jax.experimental.pallas import tpu as pltpu


def _round_up(v, m):
    return (v + m - 1) // m * m


def _samples_per_step(N, S):
    """How many samples to fold into one grid step (lane tile = spp * S)."""
    target = 2048                                   # prefer >=512-wide lane tiles
    spp = max(1, min(N, max(1, target // S)))
    if N >= 2:                                      # keep >=2 parallel steps (2 TCs)
        spp = max(1, min(spp, N // 2))
    while N % spp:
        spp -= 1
    return spp


def _trans_basic_block_kernel(x_ref, hh_ref, ww_ref,
                              w1_ref, b1_ref, w2_ref, b2_ref, o_ref,
                              *, H, W):
    """Fused relu(bn2(conv2(relu(bn1(conv1(x))))) + x) for one lane tile.

    x_ref : (Cp, L) f32   activation slab tile; lane = n*H*W + h*W + w and the
                          tile start is a multiple of S = H*W (whole samples).
    hh_ref/ww_ref : (1,L) int32 row / col index of each lane within its sample.
    w*_ref: (Cp, 9*Cp) bf16 BN-folded weights, tap-major column blocks.
    b*_ref: (Cp, 1) f32   folded BN biases.
    o_ref : (Cp, L)
    """
    Cp, L = x_ref.shape
    x = x_ref[...].astype(jnp.float32)
    hh = hh_ref[...]
    ww = ww_ref[...]

    # Tap offsets + border-validity masks.  Built once at their (Cp, L) use
    # width and reused by both convs.  The masks also zero every position
    # where a roll wraps across a sample / tile boundary, so folding the batch
    # into the lane axis is safe.
    offsets = []
    masks = []
    for dy in (-1, 0, 1):
        for dx in (-1, 0, 1):
            offsets.append(dy * W + dx)
            valid = ((hh + dy >= 0) & (hh + dy < H) &
                     (ww + dx >= 0) & (ww + dx < W))
            masks.append(jnp.broadcast_to(valid, (Cp, L)))

    def conv3x3(v, w_ref, b_ref):
        # Stack the 9 masked/rolled taps (rolls ride the XLU slot) into one
        # (9*Cp, L) operand and issue a single K=9*Cp GEMM so accumulation
        # stays inside the MXU f32 accumulator.
        parts = []
        for k, d in enumerate(offsets):
            shifted = v if d == 0 else pltpu.roll(v, shift=(-d) % L, axis=1)
            parts.append(jnp.where(masks[k], shifted, 0.0))
        stack = jnp.concatenate(parts, axis=0).astype(jnp.bfloat16)
        y = jnp.dot(w_ref[...], stack, preferred_element_type=jnp.float32)
        return y + b_ref[...]                       # bias stays in f32

    y = jnp.maximum(conv3x3(x, w1_ref, b1_ref), 0.0)       # conv1+BN1+ReLU
    y = conv3x3(y, w2_ref, b2_ref) + x                      # conv2+BN2+residual
    o_ref[...] = jnp.maximum(y, 0.0).astype(o_ref.dtype)    # final ReLU


def trans_basic_block_pallas(x_nchw, w1_oihw, b1, w2_oihw, b2):
    """Fused TransBasicBlock forward (stride=1, upsample=None, eval-mode BN).

    x_nchw:  (N, C, H, W)
    w*_oihw: (Cout, Cin, 3, 3) conv weights with BN scale already folded in
    b*:      (Cout,) folded BN bias
    """
    N, C, H, W = x_nchw.shape
    P = w2_oihw.shape[0]
    assert P == C, "residual add requires planes == inplanes"
    S = H * W
    # TODO(synk): pad the flattened spatial axis when H*W % 128 != 0.
    assert S % 128 == 0, "H*W must be a multiple of 128 for lane-dense stores"

    Cp = _round_up(C, 8)                  # pad channels to a full sublane tile
    spp = _samples_per_step(N, S)         # samples folded per grid step
    L = spp * S                           # lane-tile width (sample aligned)
    steps = N // spp
    T = steps * L                         # == N * S

    # Channel-major, lane-dense activation slab (Cp, N*H*W); padded rows = 0.
    x2d = jnp.transpose(x_nchw, (1, 0, 2, 3)).reshape(C, N * S)
    x2d = jnp.pad(x2d, ((0, Cp - C), (0, 0))).astype(jnp.float32)

    def stack_w(w_oihw):
        # (Cout,Cin,3,3) -> (Cp, 9*Cp) bf16; column = ((dy+1)*3+(dx+1))*Cp + ci
        co, ci = w_oihw.shape[:2]
        wp = jnp.zeros((Cp, Cp, 3, 3), jnp.float32).at[:co, :ci].set(w_oihw)
        return jnp.transpose(wp, (0, 2, 3, 1)).reshape(Cp, 9 * Cp).astype(jnp.bfloat16)

    def pad_b(b):
        return jnp.zeros((Cp, 1), jnp.float32).at[:b.shape[0], 0].set(b)

    w1s, w2s = stack_w(w1_oihw), stack_w(w2_oihw)
    b1p, b2p = pad_b(b1), pad_b(b2)

    # Row / col index of every lane within its sample, for ONE lane tile
    # (tiles start at sample boundaries, so the pattern is tile-invariant).
    pos = jnp.arange(L, dtype=jnp.int32) % S
    hh = (pos // W).reshape(1, L)
    ww = (pos % W).reshape(1, L)

    out2d = pl.pallas_call(
        functools.partial(_trans_basic_block_kernel, H=H, W=W),
        out_shape=jax.ShapeDtypeStruct((Cp, T), x_nchw.dtype),
        grid_spec=pltpu.PrefetchScalarGridSpec(
            num_scalar_prefetch=0,
            grid=(steps,),
            in_specs=[
                pl.BlockSpec((Cp, L), lambda i: (0, i)),        # x slab tile
                pl.BlockSpec((1, L), lambda i: (0, 0)),         # hh (tile-invariant)
                pl.BlockSpec((1, L), lambda i: (0, 0)),         # ww (tile-invariant)
                pl.BlockSpec((Cp, 9 * Cp), lambda i: (0, 0)),   # w1 (folded, bf16)
                pl.BlockSpec((Cp, 1), lambda i: (0, 0)),        # b1
                pl.BlockSpec((Cp, 9 * Cp), lambda i: (0, 0)),   # w2 (folded, bf16)
                pl.BlockSpec((Cp, 1), lambda i: (0, 0)),        # b2
            ],
            out_specs=pl.BlockSpec((Cp, L), lambda i: (0, i)),
        ),
        compiler_params=pltpu.CompilerParams(
            dimension_semantics=("parallel",),          # both v7x TCs get work
            vmem_limit_bytes=48 * 1024 * 1024,          # safe on v7x's 64 MiB VMEM
        ),
    )(x2d, hh, ww, w1s, b1p, w2s, b2p)

    out = out2d[:P].reshape(P, N, H, W)
    return jnp.transpose(out, (1, 0, 2, 3)).astype(x_nchw.dtype)


def _reference_forward(x, w1_oihw, b1, w2_oihw, b2):
    """Pure-JAX (f32) reference of the same BN-folded forward pass."""
    dn = ('NCHW', 'OIHW', 'NCHW')
    y = jax.lax.conv_general_dilated(x, w1_oihw, (1, 1), 'SAME',
                                     dimension_numbers=dn)
    y = jnp.maximum(y + b1[None, :, None, None], 0.0)
    y = jax.lax.conv_general_dilated(y, w2_oihw, (1, 1), 'SAME',
                                     dimension_numbers=dn)
    y = jnp.maximum(y + b2[None, :, None, None] + x, 0.0)
    return y


class TransBasicBlockPallas:
    """JAX/Pallas port of TransBasicBlock (stride=1, upsample=None branch)."""
    expansion = 1

    def __init__(self, inplanes, planes, stride=1, upsample=None, *,
                 eps=1e-5, key=None):
        if upsample is not None or stride != 1:
            # TODO(synk): ConvTranspose2d / upsample residual branch not implemented.
            raise NotImplementedError(
                "only the stride=1, upsample=None branch is supported")
        if planes != inplanes:
            raise ValueError("residual add requires planes == inplanes "
                             "when upsample is None")
        if key is None:
            key = jax.random.PRNGKey(0)

        ks = jax.random.split(key, 8)
        std = math.sqrt(2.0 / (inplanes * 9))
        w1 = std * jax.random.normal(ks[0], (inplanes, inplanes, 3, 3), jnp.float32)
        w2 = std * jax.random.normal(ks[1], (planes, inplanes, 3, 3), jnp.float32)

        # BatchNorm parameters (eval-mode running statistics), deterministic.
        g1 = 1.0 + 0.1 * jax.random.normal(ks[2], (inplanes,), jnp.float32)
        be1 = 0.1 * jax.random.normal(ks[3], (inplanes,), jnp.float32)
        m1 = 0.1 * jax.random.normal(ks[4], (inplanes,), jnp.float32)
        v1 = jax.random.uniform(ks[5], (inplanes,), jnp.float32, 0.5, 1.5)
        g2 = 1.0 + 0.1 * jax.random.normal(ks[6], (planes,), jnp.float32)
        be2 = 0.1 * jax.random.normal(ks[7], (planes,), jnp.float32)
        m2 = jnp.zeros((planes,), jnp.float32)
        v2 = jnp.ones((planes,), jnp.float32)

        # Fold BN (eval mode) into the conv weights / biases.
        s1 = g1 / jnp.sqrt(v1 + eps)
        s2 = g2 / jnp.sqrt(v2 + eps)
        self.w1_oihw = w1 * s1[:, None, None, None]
        self.b1 = be1 - m1 * s1
        self.w2_oihw = w2 * s2[:, None, None, None]
        self.b2 = be2 - m2 * s2

    def forward(self, x_nchw):
        return trans_basic_block_pallas(
            x_nchw, self.w1_oihw, self.b1, self.w2_oihw, self.b2)


if __name__ == "__main__":
    key = jax.random.PRNGKey(0)
    k_x, k_mod = jax.random.split(key)

    # Small shapes consistent with the module: batch=2, channels=4, 16x16.
    N, C, H, W = 2, 4, 16, 16
    x = jax.random.normal(k_x, (N, C, H, W), dtype=jnp.float32)

    block = TransBasicBlockPallas(inplanes=C, planes=C, stride=1,
                                  upsample=None, key=k_mod)
    out = jax.block_until_ready(block.forward(x))

    ref = _reference_forward(x, block.w1_oihw, block.b1,
                             block.w2_oihw, block.b2)
    assert out.shape == (N, C, H, W)
    max_err = float(jnp.max(jnp.abs(out - ref)))
    # bf16 MXU operands (f32 accumulation / bias / residual / ReLU) ->
    # ~1e-2-level deviation vs the f32 reference is expected.
    assert jnp.allclose(out, ref, atol=1e-1, rtol=1e-2), f"max abs err {max_err}"

    print("KERNEL_OK")
</pallas_src>

<mosaic_0001>
module attributes {stable_mosaic.version = 11 : i64} {
  func.func @_trans_basic_block_kernel(%arg0: i32, %arg1: memref<8x256xf32, #tpu.memory_space<vmem>>, %arg2: memref<1x256xi32, #tpu.memory_space<vmem>>, %arg3: memref<1x256xi32, #tpu.memory_space<vmem>>, %arg4: memref<8x72xbf16, #tpu.memory_space<vmem>>, %arg5: memref<8x1xf32, #tpu.memory_space<vmem>>, %arg6: memref<8x72xbf16, #tpu.memory_space<vmem>>, %arg7: memref<8x1xf32, #tpu.memory_space<vmem>>, %arg8: memref<8x256xf32, #tpu.memory_space<vmem>>) attributes {dimension_semantics = [#tpu.dimension_semantics<parallel>], iteration_bounds = array<i64: 2>, scalar_prefetch = 0 : i64, scratch_operands = 0 : i64, tpu.core_type = #tpu.core_type<tc>, window_params = [{transform_indices = @transform_0, window_bounds = array<i64: 8, 256>}, {pipeline_mode = #tpu.pipeline_mode<synchronous>, transform_indices = @transform_1, window_bounds = array<i64: 1, 256>}, {pipeline_mode = #tpu.pipeline_mode<synchronous>, transform_indices = @transform_2, window_bounds = array<i64: 1, 256>}, {pipeline_mode = #tpu.pipeline_mode<synchronous>, transform_indices = @transform_3, window_bounds = array<i64: 8, 72>}, {pipeline_mode = #tpu.pipeline_mode<synchronous>, transform_indices = @transform_4, window_bounds = array<i64: 8, 1>}, {pipeline_mode = #tpu.pipeline_mode<synchronous>, transform_indices = @transform_5, window_bounds = array<i64: 8, 72>}, {pipeline_mode = #tpu.pipeline_mode<synchronous>, transform_indices = @transform_6, window_bounds = array<i64: 8, 1>}, {transform_indices = @transform_7, window_bounds = array<i64: 8, 256>}]} {
    %c0 = arith.constant 0 : index
    %c0_0 = arith.constant 0 : index
    %0 = vector.load %arg1[%c0, %c0_0] : memref<8x256xf32, #tpu.memory_space<vmem>>, vector<8x256xf32>
    %c0_1 = arith.constant 0 : index
    %c0_2 = arith.constant 0 : index
    %1 = vector.load %arg2[%c0_1, %c0_2] : memref<1x256xi32, #tpu.memory_space<vmem>>, vector<1x256xi32>
    %c0_3 = arith.constant 0 : index
    %c0_4 = arith.constant 0 : index
    %2 = vector.load %arg3[%c0_3, %c0_4] : memref<1x256xi32, #tpu.memory_space<vmem>>, vector<1x256xi32>
    %c-1_i32 = arith.constant -1 : i32
    %3 = vector.broadcast %c-1_i32 : i32 to vector<1x256xi32>
    %4 = arith.addi %1, %3 : vector<1x256xi32>
    %c0_i32 = arith.constant 0 : i32
    %5 = vector.broadcast %c0_i32 : i32 to vector<1x256xi32>
    %6 = arith.cmpi sge, %4, %5 : vector<1x256xi32>
    %c-1_i32_5 = arith.constant -1 : i32
    %7 = vector.broadcast %c-1_i32_5 : i32 to vector<1x256xi32>
    %8 = arith.addi %1, %7 : vector<1x256xi32>
    %c16_i32 = arith.constant 16 : i32
    %9 = vector.broadcast %c16_i32 : i32 to vector<1x256xi32>
    %10 = arith.cmpi slt, %8, %9 : vector<1x256xi32>
    %11 = arith.andi %6, %10 : vector<1x256xi1>
    %c-1_i32_6 = arith.constant -1 : i32
    %12 = vector.broadcast %c-1_i32_6 : i32 to vector<1x256xi32>
    %13 = arith.addi %2, %12 : vector<1x256xi32>
    %c0_i32_7 = arith.constant 0 : i32
    %14 = vector.broadcast %c0_i32_7 : i32 to vector<1x256xi32>
    %15 = arith.cmpi sge, %13, %14 : vector<1x256xi32>
    %16 = arith.andi %11, %15 : vector<1x256xi1>
    %c-1_i32_8 = arith.constant -1 : i32
    %17 = vector.broadcast %c-1_i32_8 : i32 to vector<1x256xi32>
    %18 = arith.addi %2, %17 : vector<1x256xi32>
    %c16_i32_9 = arith.constant 16 : i32
    %19 = vector.broadcast %c16_i32_9 : i32 to vector<1x256xi32>
    %20 = arith.cmpi slt, %18, %19 : vector<1x256xi32>
    %21 = arith.andi %16, %20 : vector<1x256xi1>
    %22 = vector.shape_cast %21 : vector<1x256xi1> to vector<1x256xi1>
    %23 = vector.broadcast %22 : vector<1x256xi1> to vector<8x256xi1>
    %c-1_i32_10 = arith.constant -1 : i32
    %24 = vector.broadcast %c-1_i32_10 : i32 to vector<1x256xi32>
    %25 = arith.addi %1, %24 : vector<1x256xi32>
    %c0_i32_11 = arith.constant 0 : i32
    %26 = vector.broadcast %c0_i32_11 : i32 to vector<1x256xi32>
    %27 = arith.cmpi sge, %25, %26 : vector<1x256xi32>
    %c-1_i32_12 = arith.constant -1 : i32
    %28 = vector.broadcast %c-1_i32_12 : i32 to vector<1x256xi32>
    %29 = arith.addi %1, %28 : vector<1x256xi32>
    %c16_i32_13 = arith.constant 16 : i32
    %30 = vector.broadcast %c16_i32_13 : i32 to vector<1x256xi32>
    %31 = arith.cmpi slt, %29, %30 : vector<1x256xi32>
    %32 = arith.andi %27, %31 : vector<1x256xi1>
    %c0_i32_14 = arith.constant 0 : i32
    %33 = vector.broadcast %c0_i32_14 : i32 to vector<1x256xi32>
    %34 = arith.addi %2, %33 : vector<1x256xi32>
    %c0_i32_15 = arith.constant 0 : i32
    %35 = vector.broadcast %c0_i32_15 : i32 to vector<1x256xi32>
    %36 = arith.cmpi sge, %34, %35 : vector<1x256xi32>
    %37 = arith.andi %32, %36 : vector<1x256xi1>
    %c0_i32_16 = arith.constant 0 : i32
    %38 = vector.broadcast %c0_i32_16 : i32 to vector<1x256xi32>
    %39 = arith.addi %2, %38 : vector<1x256xi32>
    %c16_i32_17 = arith.constant 16 : i32
    %40 = vector.broadcast %c16_i32_17 : i32 to vector<1x256xi32>
    %41 = arith.cmpi slt, %39, %40 : vector<1x256xi32>
    %42 = arith.andi %37, %41 : vector<1x256xi1>
    %43 = vector.shape_cast %42 : vector<1x256xi1> to vector<1x256xi1>
    %44 = vector.broadcast %43 : vector<1x256xi1> to vector<8x256xi1>
    %c-1_i32_18 = arith.constant -1 : i32
    %45 = vector.broadcast %c-1_i32_18 : i32 to vector<1x256xi32>
    %46 = arith.addi %1, %45 : vector<1x256xi32>
    %c0_i32_19 = arith.constant 0 : i32
    %47 = vector.broadcast %c0_i32_19 : i32 to vector<1x256xi32>
    %48 = arith.cmpi sge, %46, %47 : vector<1x256xi32>
    %c-1_i32_20 = arith.constant -1 : i32
    %49 = vector.broadcast %c-1_i32_20 : i32 to vector<1x256xi32>
    %50 = arith.addi %1, %49 : vector<1x256xi32>
    %c16_i32_21 = arith.constant 16 : i32
    %51 = vector.broadcast %c16_i32_21 : i32 to vector<1x256xi32>
    %52 = arith.cmpi slt, %50, %51 : vector<1x256xi32>
    %53 = arith.andi %48, %52 : vector<1x256xi1>
    %c1_i32 = arith.constant 1 : i32
    %54 = vector.broadcast %c1_i32 : i32 to vector<1x256xi32>
    %55 = arith.addi %2, %54 : vector<1x256xi32>
    %c0_i32_22 = arith.constant 0 : i32
    %56 = vector.broadcast %c0_i32_22 : i32 to vector<1x256xi32>
    %57 = arith.cmpi sge, %55, %56 : vector<1x256xi32>
    %58 = arith.andi %53, %57 : vector<1x256xi1>
    %c1_i32_23 = arith.constant 1 : i32
    %59 = vector.broadcast %c1_i32_23 : i32 to vector<1x256xi32>
    %60 = arith.addi %2, %59 : vector<1x256xi32>
    %c16_i32_24 = arith.constant 16 : i32
    %61 = vector.broadcast %c16_i32_24 : i32 to vector<1x256xi32>
    %62 = arith.cmpi slt, %60, %61 : vector<1x256xi32>
    %63 = arith.andi %58, %62 : vector<1x256xi1>
    %64 = vector.shape_cast %63 : vector<1x256xi1> to vector<1x256xi1>
    %65 = vector.broadcast %64 : vector<1x256xi1> to vector<8x256xi1>
    %c0_i32_25 = arith.constant 0 : i32
    %66 = vector.broadcast %c0_i32_25 : i32 to vector<1x256xi32>
    %67 = arith.addi %1, %66 : vector<1x256xi32>
    %c0_i32_26 = arith.constant 0 : i32
    %68 = vector.broadcast %c0_i32_26 : i32 to vector<1x256xi32>
    %69 = arith.cmpi sge, %67, %68 : vector<1x256xi32>
    %c0_i32_27 = arith.constant 0 : i32
    %70 = vector.broadcast %c0_i32_27 : i32 to vector<1x256xi32>
    %71 = arith.addi %1, %70 : vector<1x256xi32>
    %c16_i32_28 = arith.constant 16 : i32
    %72 = vector.broadcast %c16_i32_28 : i32 to vector<1x256xi32>
    %73 = arith.cmpi slt, %71, %72 : vector<1x256xi32>
    %74 = arith.andi %69, %73 : vector<1x256xi1>
    %c-1_i32_29 = arith.constant -1 : i32
    %75 = vector.broadcast %c-1_i32_29 : i32 to vector<1x256xi32>
    %76 = arith.addi %2, %75 : vector<1x256xi32>
    %c0_i32_30 = arith.constant 0 : i32
    %77 = vector.broadcast %c0_i32_30 : i32 to vector<1x256xi32>
    %78 = arith.cmpi sge, %76, %77 : vector<1x256xi32>
    %79 = arith.andi %74, %78 : vector<1x256xi1>
    %c-1_i32_31 = arith.constant -1 : i32
    %80 = vector.broadcast %c-1_i32_31 : i32 to vector<1x256xi32>
    %81 = arith.addi %2, %80 : vector<1x256xi32>
    %c16_i32_32 = arith.constant 16 : i32
    %82 = vector.broadcast %c16_i32_32 : i32 to vector<1x256xi32>
    %83 = arith.cmpi slt, %81, %82 : vector<1x256xi32>
    %84 = arith.andi %79, %83 : vector<1x256xi1>
    %85 = vector.shape_cast %84 : vector<1x256xi1> to vector<1x256xi1>
    %86 = vector.broadcast %85 : vector<1x256xi1> to vector<8x256xi1>
    %c0_i32_33 = arith.constant 0 : i32
    %87 = vector.broadcast %c0_i32_33 : i32 to vector<1x256xi32>
    %88 = arith.addi %1, %87 : vector<1x256xi32>
    %c0_i32_34 = arith.constant 0 : i32
    %89 = vector.broadcast %c0_i32_34 : i32 to vector<1x256xi32>
    %90 = arith.cmpi sge, %88, %89 : vector<1x256xi32>
    %c0_i32_35 = arith.constant 0 : i32
    %91 = vector.broadcast %c0_i32_35 : i32 to vector<1x256xi32>
    %92 = arith.addi %1, %91 : vector<1x256xi32>
    %c16_i32_36 = arith.constant 16 : i32
    %93 = vector.broadcast %c16_i32_36 : i32 to vector<1x256xi32>
    %94 = arith.cmpi slt, %92, %93 : vector<1x256xi32>
    %95 = arith.andi %90, %94 : vector<1x256xi1>
    %c0_i32_37 = arith.constant 0 : i32
    %96 = vector.broadcast %c0_i32_37 : i32 to vector<1x256xi32>
    %97 = arith.addi %2, %96 : vector<1x256xi32>
    %c0_i32_38 = arith.constant 0 : i32
    %98 = vector.broadcast %c0_i32_38 : i32 to vector<1x256xi32>
    %99 = arith.cmpi sge, %97, %98 : vector<1x256xi32>
    %100 = arith.andi %95, %99 : vector<1x256xi1>
    %c0_i32_39 = arith.constant 0 : i32
    %101 = vector.broadcast %c0_i32_39 : i32 to vector<1x256xi32>
    %102 = arith.addi %2, %101 : vector<1x256xi32>
    %c16_i32_40 = arith.constant 16 : i32
    %103 = vector.broadcast %c16_i32_40 : i32 to vector<1x256xi32>
    %104 = arith.cmpi slt, %102, %103 : vector<1x256xi32>
    %105 = arith.andi %100, %104 : vector<1x256xi1>
    %106 = vector.shape_cast %105 : vector<1x256xi1> to vector<1x256xi1>
    %107 = vector.broadcast %106 : vector<1x256xi1> to vector<8x256xi1>
    %c0_i32_41 = arith.constant 0 : i32
    %108 = vector.broadcast %c0_i32_41 : i32 to vector<1x256xi32>
    %109 = arith.addi %1, %108 : vector<1x256xi32>
    %c0_i32_42 = arith.constant 0 : i32
    %110 = vector.broadcast %c0_i32_42 : i32 to vector<1x256xi32>
    %111 = arith.cmpi sge, %109, %110 : vector<1x256xi32>
    %c0_i32_43 = arith.constant 0 : i32
    %112 = vector.broadcast %c0_i32_43 : i32 to vector<1x256xi32>
    %113 = arith.addi %1, %112 : vector<1x256xi32>
    %c16_i32_44 = arith.constant 16 : i32
    %114 = vector.broadcast %c16_i32_44 : i32 to vector<1x256xi32>
    %115 = arith.cmpi slt, %113, %114 : vector<1x256xi32>
    %116 = arith.andi %111, %115 : vector<1x256xi1>
    %c1_i32_45 = arith.constant 1 : i32
    %117 = vector.broadcast %c1_i32_45 : i32 to vector<1x256xi32>
    %118 = arith.addi %2, %117 : vector<1x256xi32>
    %c0_i32_46 = arith.constant 0 : i32
    %119 = vector.broadcast %c0_i32_46 : i32 to vector<1x256xi32>
    %120 = arith.cmpi sge, %118, %119 : vector<1x256xi32>
    %121 = arith.andi %116, %120 : vector<1x256xi1>
    %c1_i32_47 = arith.constant 1 : i32
    %122 = vector.broadcast %c1_i32_47 : i32 to vector<1x256xi32>
    %123 = arith.addi %2, %122 : vector<1x256xi32>
    %c16_i32_48 = arith.constant 16 : i32
    %124 = vector.broadcast %c16_i32_48 : i32 to vector<1x256xi32>
    %125 = arith.cmpi slt, %123, %124 : vector<1x256xi32>
    %126 = arith.andi %121, %125 : vector<1x256xi1>
    %127 = vector.shape_cast %126 : vector<1x256xi1> to vector<1x256xi1>
    %128 = vector.broadcast %127 : vector<1x256xi1> to vector<8x256xi1>
    %c1_i32_49 = arith.constant 1 : i32
    %129 = vector.broadcast %c1_i32_49 : i32 to vector<1x256xi32>
    %130 = arith.addi %1, %129 : vector<1x256xi32>
    %c0_i32_50 = arith.constant 0 : i32
    %131 = vector.broadcast %c0_i32_50 : i32 to vector<1x256xi32>
    %132 = arith.cmpi sge, %130, %131 : vector<1x256xi32>
    %c1_i32_51 = arith.constant 1 : i32
    %133 = vector.broadcast %c1_i32_51 : i32 to vector<1x256xi32>
    %134 = arith.addi %1, %133 : vector<1x256xi32>
    %c16_i32_52 = arith.constant 16 : i32
    %135 = vector.broadcast %c16_i32_52 : i32 to vector<1x256xi32>
    %136 = arith.cmpi slt, %134, %135 : vector<1x256xi32>
    %137 = arith.andi %132, %136 : vector<1x256xi1>
    %c-1_i32_53 = arith.constant -1 : i32
    %138 = vector.broadcast %c-1_i32_53 : i32 to vector<1x256xi32>
    %139 = arith.addi %2, %138 : vector<1x256xi32>
    %c0_i32_54 = arith.constant 0 : i32
    %140 = vector.broadcast %c0_i32_54 : i32 to vector<1x256xi32>
    %141 = arith.cmpi sge, %139, %140 : vector<1x256xi32>
    %142 = arith.andi %137, %141 : vector<1x256xi1>
    %c-1_i32_55 = arith.constant -1 : i32
    %143 = vector.broadcast %c-1_i32_55 : i32 to vector<1x256xi32>
    %144 = arith.addi %2, %143 : vector<1x256xi32>
    %c16_i32_56 = arith.constant 16 : i32
    %145 = vector.broadcast %c16_i32_56 : i32 to vector<1x256xi32>
    %146 = arith.cmpi slt, %144, %145 : vector<1x256xi32>
    %147 = arith.andi %142, %146 : vector<1x256xi1>
    %148 = vector.shape_cast %147 : vector<1x256xi1> to vector<1x256xi1>
    %149 = vector.broadcast %148 : vector<1x256xi1> to vector<8x256xi1>
    %c1_i32_57 = arith.constant 1 : i32
    %150 = vector.broadcast %c1_i32_57 : i32 to vector<1x256xi32>
    %151 = arith.addi %1, %150 : vector<1x256xi32>
    %c0_i32_58 = arith.constant 0 : i32
    %152 = vector.broadcast %c0_i32_58 : i32 to vector<1x256xi32>
    %153 = arith.cmpi sge, %151, %152 : vector<1x256xi32>
    %c1_i32_59 = arith.constant 1 : i32
    %154 = vector.broadcast %c1_i32_59 : i32 to vector<1x256xi32>
    %155 = arith.addi %1, %154 : vector<1x256xi32>
    %c16_i32_60 = arith.constant 16 : i32
    %156 = vector.broadcast %c16_i32_60 : i32 to vector<1x256xi32>
    %157 = arith.cmpi slt, %155, %156 : vector<1x256xi32>
    %158 = arith.andi %153, %157 : vector<1x256xi1>
    %c0_i32_61 = arith.constant 0 : i32
    %159 = vector.broadcast %c0_i32_61 : i32 to vector<1x256xi32>
    %160 = arith.addi %2, %159 : vector<1x256xi32>
    %c0_i32_62 = arith.constant 0 : i32
    %161 = vector.broadcast %c0_i32_62 : i32 to vector<1x256xi32>
    %162 = arith.cmpi sge, %160, %161 : vector<1x256xi32>
    %163 = arith.andi %158, %162 : vector<1x256xi1>
    %c0_i32_63 = arith.constant 0 : i32
    %164 = vector.broadcast %c0_i32_63 : i32 to vector<1x256xi32>
    %165 = arith.addi %2, %164 : vector<1x256xi32>
    %c16_i32_64 = arith.constant 16 : i32
    %166 = vector.broadcast %c16_i32_64 : i32 to vector<1x256xi32>
    %167 = arith.cmpi slt, %165, %166 : vector<1x256xi32>
    %168 = arith.andi %163, %167 : vector<1x256xi1>
    %169 = vector.shape_cast %168 : vector<1x256xi1> to vector<1x256xi1>
    %170 = vector.broadcast %169 : vector<1x256xi1> to vector<8x256xi1>
    %c1_i32_65 = arith.constant 1 : i32
    %171 = vector.broadcast %c1_i32_65 : i32 to vector<1x256xi32>
    %172 = arith.addi %1, %171 : vector<1x256xi32>
    %c0_i32_66 = arith.constant 0 : i32
    %173 = vector.broadcast %c0_i32_66 : i32 to vector<1x256xi32>
    %174 = arith.cmpi sge, %172, %173 : vector<1x256xi32>
    %c1_i32_67 = arith.constant 1 : i32
    %175 = vector.broadcast %c1_i32_67 : i32 to vector<1x256xi32>
    %176 = arith.addi %1, %175 : vector<1x256xi32>
    %c16_i32_68 = arith.constant 16 : i32
    %177 = vector.broadcast %c16_i32_68 : i32 to vector<1x256xi32>
    %178 = arith.cmpi slt, %176, %177 : vector<1x256xi32>
    %179 = arith.andi %174, %178 : vector<1x256xi1>
    %c1_i32_69 = arith.constant 1 : i32
    %180 = vector.broadcast %c1_i32_69 : i32 to vector<1x256xi32>
    %181 = arith.addi %2, %180 : vector<1x256xi32>
    %c0_i32_70 = arith.constant 0 : i32
    %182 = vector.broadcast %c0_i32_70 : i32 to vector<1x256xi32>
    %183 = arith.cmpi sge, %181, %182 : vector<1x256xi32>
    %184 = arith.andi %179, %183 : vector<1x256xi1>
    %c1_i32_71 = arith.constant 1 : i32
    %185 = vector.broadcast %c1_i32_71 : i32 to vector<1x256xi32>
    %186 = arith.addi %2, %185 : vector<1x256xi32>
    %c16_i32_72 = arith.constant 16 : i32
    %187 = vector.broadcast %c16_i32_72 : i32 to vector<1x256xi32>
    %188 = arith.cmpi slt, %186, %187 : vector<1x256xi32>
    %189 = arith.andi %184, %188 : vector<1x256xi1>
    %190 = vector.shape_cast %189 : vector<1x256xi1> to vector<1x256xi1>
    %191 = vector.broadcast %190 : vector<1x256xi1> to vector<8x256xi1>
    %c17_i32 = arith.constant 17 : i32
    %192 = tpu.dynamic_rotate %0 by %c17_i32 dim 1 : vector<8x256xf32>, i32 -> vector<8x256xf32>
    %cst = arith.constant 0.000000e+00 : f32
    %193 = vector.broadcast %cst : f32 to vector<8x256xf32>
    %194 = arith.select %23, %192, %193 : vector<8x256xi1>, vector<8x256xf32>
    %c16_i32_73 = arith.constant 16 : i32
    %195 = tpu.dynamic_rotate %0 by %c16_i32_73 dim 1 : vector<8x256xf32>, i32 -> vector<8x256xf32>
    %cst_74 = arith.constant 0.000000e+00 : f32
    %196 = vector.broadcast %cst_74 : f32 to vector<8x256xf32>
    %197 = arith.select %44, %195, %196 : vector<8x256xi1>, vector<8x256xf32>
    %c15_i32 = arith.constant 15 : i32
    %198 = tpu.dynamic_rotate %0 by %c15_i32 dim 1 : vector<8x256xf32>, i32 -> vector<8x256xf32>
    %cst_75 = arith.constant 0.000000e+00 : f32
    %199 = vector.broadcast %cst_75 : f32 to vector<8x256xf32>
    %200 = arith.select %65, %198, %199 : vector<8x256xi1>, vector<8x256xf32>
    %c1_i32_76 = arith.constant 1 : i32
    %201 = tpu.dynamic_rotate %0 by %c1_i32_76 dim 1 : vector<8x256xf32>, i32 -> vector<8x256xf32>
    %cst_77 = arith.constant 0.000000e+00 : f32
    %202 = vector.broadcast %cst_77 : f32 to vector<8x256xf32>
    %203 = arith.select %86, %201, %202 : vector<8x256xi1>, vector<8x256xf32>
    %cst_78 = arith.constant 0.000000e+00 : f32
    %204 = vector.broadcast %cst_78 : f32 to vector<8x256xf32>
    %205 = arith.select %107, %0, %204 : vector<8x256xi1>, vector<8x256xf32>
    %c255_i32 = arith.constant 255 : i32
    %206 = tpu.dynamic_rotate %0 by %c255_i32 dim 1 : vector<8x256xf32>, i32 -> vector<8x256xf32>
    %cst_79 = arith.constant 0.000000e+00 : f32
    %207 = vector.broadcast %cst_79 : f32 to vector<8x256xf32>
    %208 = arith.select %128, %206, %207 : vector<8x256xi1>, vector<8x256xf32>
    %c241_i32 = arith.constant 241 : i32
    %209 = tpu.dynamic_rotate %0 by %c241_i32 dim 1 : vector<8x256xf32>, i32 -> vector<8x256xf32>
    %cst_80 = arith.constant 0.000000e+00 : f32
    %210 = vector.broadcast %cst_80 : f32 to vector<8x256xf32>
    %211 = arith.select %149, %209, %210 : vector<8x256xi1>, vector<8x256xf32>
    %c240_i32 = arith.constant 240 : i32
    %212 = tpu.dynamic_rotate %0 by %c240_i32 dim 1 : vector<8x256xf32>, i32 -> vector<8x256xf32>
    %cst_81 = arith.constant 0.000000e+00 : f32
    %213 = vector.broadcast %cst_81 : f32 to vector<8x256xf32>
    %214 = arith.select %170, %212, %213 : vector<8x256xi1>, vector<8x256xf32>
    %c239_i32 = arith.constant 239 : i32
    %215 = tpu.dynamic_rotate %0 by %c239_i32 dim 1 : vector<8x256xf32>, i32 -> vector<8x256xf32>
    %cst_82 = arith.constant 0.000000e+00 : f32
    %216 = vector.broadcast %cst_82 : f32 to vector<8x256xf32>
    %217 = arith.select %191, %215, %216 : vector<8x256xi1>, vector<8x256xf32>
    %218 = tpu.concatenate %194, %197, %200, %203, %205, %208, %211, %214, %217 in 0 : vector<8x256xf32>, vector<8x256xf32>, vector<8x256xf32>, vector<8x256xf32>, vector<8x256xf32>, vector<8x256xf32>, vector<8x256xf32>, vector<8x256xf32>, vector<8x256xf32> -> vector<72x256xf32>
    %219 = arith.truncf %218 : vector<72x256xf32> to vector<72x256xbf16>
    %c0_83 = arith.constant 0 : index
    %c0_84 = arith.constant 0 : index
    %220 = vector.load %arg4[%c0_83, %c0_84] : memref<8x72xbf16, #tpu.memory_space<vmem>>, vector<8x72xbf16>
    %cst_85 = arith.constant dense<0.000000e+00> : vector<8x256xf32>
    %221 = tpu.matmul %220, %219, %cst_85 {dimension_numbers = #tpu.dot_dimension_numbers<[1], [0], [0], [1], [0, 0, 1, 1], [], []>} : vector<8x72xbf16>, vector<72x256xbf16>, vector<8x256xf32> -> vector<8x256xf32>
    %c0_86 = arith.constant 0 : index
    %c0_87 = arith.constant 0 : index
    %222 = vector.load %arg5[%c0_86, %c0_87] : memref<8x1xf32, #tpu.memory_space<vmem>>, vector<8x1xf32>
    %223 = vector.broadcast %222 : vector<8x1xf32> to vector<8x256xf32>
    %224 = arith.addf %221, %223 : vector<8x256xf32>
    %cst_88 = arith.constant 0.000000e+00 : f32
    %225 = vector.broadcast %cst_88 : f32 to vector<8x256xf32>
    %226 = arith.maximumf %224, %225 : vector<8x256xf32>
    %c17_i32_89 = arith.constant 17 : i32
    %227 = tpu.dynamic_rotate %226 by %c17_i32_89 dim 1 : vector<8x256xf32>, i32 -> vector<8x256xf32>
    %cst_90 = arith.constant 0.000000e+00 : f32
    %228 = vector.broadcast %cst_90 : f32 to vector<8x256xf32>
    %229 = arith.select %23, %227, %228 : vector<8x256xi1>, vector<8x256xf32>
    %c16_i32_91 = arith.constant 16 : i32
    %230 = tpu.dynamic_rotate %226 by %c16_i32_91 dim 1 : vector<8x256xf32>, i32 -> vector<8x256xf32>
    %cst_92 = arith.constant 0.000000e+00 : f32
    %231 = vector.broadcast %cst_92 : f32 to vector<8x256xf32>
    %232 = arith.select %44, %230, %231 : vector<8x256xi1>, vector<8x256xf32>
    %c15_i32_93 = arith.constant 15 : i32
    %233 = tpu.dynamic_rotate %226 by %c15_i32_93 dim 1 : vector<8x256xf32>, i32 -> vector<8x256xf32>
    %cst_94 = arith.constant 0.000000e+00 : f32
    %234 = vector.broadcast %cst_94 : f32 to vector<8x256xf32>
    %235 = arith.select %65, %233, %234 : vector<8x256xi1>, vector<8x256xf32>
    %c1_i32_95 = arith.constant 1 : i32
    %236 = tpu.dynamic_rotate %226 by %c1_i32_95 dim 1 : vector<8x256xf32>, i32 -> vector<8x256xf32>
    %cst_96 = arith.constant 0.000000e+00 : f32
    %237 = vector.broadcast %cst_96 : f32 to vector<8x256xf32>
    %238 = arith.select %86, %236, %237 : vector<8x256xi1>, vector<8x256xf32>
    %cst_97 = arith.constant 0.000000e+00 : f32
    %239 = vector.broadcast %cst_97 : f32 to vector<8x256xf32>
    %240 = arith.select %107, %226, %239 : vector<8x256xi1>, vector<8x256xf32>
    %c255_i32_98 = arith.constant 255 : i32
    %241 = tpu.dynamic_rotate %226 by %c255_i32_98 dim 1 : vector<8x256xf32>, i32 -> vector<8x256xf32>
    %cst_99 = arith.constant 0.000000e+00 : f32
    %242 = vector.broadcast %cst_99 : f32 to vector<8x256xf32>
    %243 = arith.select %128, %241, %242 : vector<8x256xi1>, vector<8x256xf32>
    %c241_i32_100 = arith.constant 241 : i32
    %244 = tpu.dynamic_rotate %226 by %c241_i32_100 dim 1 : vector<8x256xf32>, i32 -> vector<8x256xf32>
    %cst_101 = arith.constant 0.000000e+00 : f32
    %245 = vector.broadcast %cst_101 : f32 to vector<8x256xf32>
    %246 = arith.select %149, %244, %245 : vector<8x256xi1>, vector<8x256xf32>
    %c240_i32_102 = arith.constant 240 : i32
    %247 = tpu.dynamic_rotate %226 by %c240_i32_102 dim 1 : vector<8x256xf32>, i32 -> vector<8x256xf32>
    %cst_103 = arith.constant 0.000000e+00 : f32
    %248 = vector.broadcast %cst_103 : f32 to vector<8x256xf32>
    %249 = arith.select %170, %247, %248 : vector<8x256xi1>, vector<8x256xf32>
    %c239_i32_104 = arith.constant 239 : i32
    %250 = tpu.dynamic_rotate %226 by %c239_i32_104 dim 1 : vector<8x256xf32>, i32 -> vector<8x256xf32>
    %cst_105 = arith.constant 0.000000e+00 : f32
    %251 = vector.broadcast %cst_105 : f32 to vector<8x256xf32>
    %252 = arith.select %191, %250, %251 : vector<8x256xi1>, vector<8x256xf32>
    %253 = tpu.concatenate %229, %232, %235, %238, %240, %243, %246, %249, %252 in 0 : vector<8x256xf32>, vector<8x256xf32>, vector<8x256xf32>, vector<8x256xf32>, vector<8x256xf32>, vector<8x256xf32>, vector<8x256xf32>, vector<8x256xf32>, vector<8x256xf32> -> vector<72x256xf32>
    %254 = arith.truncf %253 : vector<72x256xf32> to vector<72x256xbf16>
    %c0_106 = arith.constant 0 : index
    %c0_107 = arith.constant 0 : index
    %255 = vector.load %arg6[%c0_106, %c0_107] : memref<8x72xbf16, #tpu.memory_space<vmem>>, vector<8x72xbf16>
    %cst_108 = arith.constant dense<0.000000e+00> : vector<8x256xf32>
    %256 = tpu.matmul %255, %254, %cst_108 {dimension_numbers = #tpu.dot_dimension_numbers<[1], [0], [0], [1], [0, 0, 1, 1], [], []>} : vector<8x72xbf16>, vector<72x256xbf16>, vector<8x256xf32> -> vector<8x256xf32>
    %c0_109 = arith.constant 0 : index
    %c0_110 = arith.constant 0 : index
    %257 = vector.load %arg7[%c0_109, %c0_110] : memref<8x1xf32, #tpu.memory_space<vmem>>, vector<8x1xf32>
    %258 = vector.broadcast %257 : vector<8x1xf32> to vector<8x256xf32>
    %259 = arith.addf %256, %258 : vector<8x256xf32>
    %260 = arith.addf %259, %0 : vector<8x256xf32>
    %cst_111 = arith.constant 0.000000e+00 : f32
    %261 = vector.broadcast %cst_111 : f32 to vector<8x256xf32>
    %262 = arith.maximumf %260, %261 : vector<8x256xf32>
    %c0_112 = arith.constant 0 : index
    %c0_113 = arith.constant 0 : index
    %263 = vector.load %arg8[%c0_112, %c0_113] : memref<8x256xf32, #tpu.memory_space<vmem>>, vector<8x256xf32>
    tpu.vector_store %arg8[%c0_112, %c0_113], %262 {strides = array<i32>} : memref<8x256xf32, #tpu.memory_space<vmem>>, vector<8x256xf32>,
    return
  }
  func.func @transform_0(%arg0: i32) -> (i32, i32) {
    %c0_i32 = arith.constant 0 : i32
    %c0_i32_0 = arith.constant 0 : i32
    return %c0_i32, %arg0 : i32, i32
  }
  func.func @transform_1(%arg0: i32) -> (i32, i32) {
    %c0_i32 = arith.constant 0 : i32
    %c0_i32_0 = arith.constant 0 : i32
    %c0_i32_1 = arith.constant 0 : i32
    return %c0_i32, %c0_i32_0 : i32, i32
  }
  func.func @transform_2(%arg0: i32) -> (i32, i32) {
    %c0_i32 = arith.constant 0 : i32
    %c0_i32_0 = arith.constant 0 : i32
    %c0_i32_1 = arith.constant 0 : i32
    return %c0_i32, %c0_i32_0 : i32, i32
  }
  func.func @transform_3(%arg0: i32) -> (i32, i32) {
    %c0_i32 = arith.constant 0 : i32
    %c0_i32_0 = arith.constant 0 : i32
    %c0_i32_1 = arith.constant 0 : i32
    return %c0_i32, %c0_i32_0 : i32, i32
  }
  func.func @transform_4(%arg0: i32) -> (i32, i32) {
    %c0_i32 = arith.constant 0 : i32
    %c0_i32_0 = arith.constant 0 : i32
    %c0_i32_1 = arith.constant 0 : i32
    return %c0_i32, %c0_i32_0 : i32, i32
  }
  func.func @transform_5(%arg0: i32) -> (i32, i32) {
    %c0_i32 = arith.constant 0 : i32
    %c0_i32_0 = arith.constant 0 : i32
    %c0_i32_1 = arith.constant 0 : i32
    return %c0_i32, %c0_i32_0 : i32, i32
  }
  func.func @transform_6(%arg0: i32) -> (i32, i32) {
    %c0_i32 = arith.constant 0 : i32
    %c0_i32_0 = arith.constant 0 : i32
    %c0_i32_1 = arith.constant 0 : i32
    return %c0_i32, %c0_i32_0 : i32, i32
  }
  func.func @transform_7(%arg0: i32) -> (i32, i32) {
    %c0_i32 = arith.constant 0 : i32
    %c0_i32_0 = arith.constant 0 : i32
    return %c0_i32, %arg0 : i32, i32
  }
}

</mosaic_0001>

<bundles_post_ra>
// kernel: tpu_custom_call.1
= control target key start
LH: loop header
LB: loop body
LE: loop exit
PB: predicated region body
PF: predicated region fallthrough
CT: control target
= control target key end

     0   :  { %12 = vsyncpa [#allocation3], 0  ;;  %s1793_s0 = inlined_call_operand.hbm [shape: f32[8,512], index: 0, kind: input, shape index: {}]   ;;  %s1794_s1 = inlined_call_operand.vmem [shape: s32[1,256], index: 1, kind: input, shape index: {}]   ;;  %s1795_s2 = inlined_call_operand.vmem [shape: s32[1,256], index: 2, kind: input, shape index: {}]   ;;  %s1796_s3 = inlined_call_operand.vmem [shape: bf16[8,72], index: 3, kind: input, shape index: {}]   ;;  %s1797_s4 = inlined_call_operand.vmem [shape: f32[8,1], index: 4, kind: input, shape index: {}]   ;;  %s1798_s5 = inlined_call_operand.vmem [shape: bf16[8,72], index: 5, kind: input, shape index: {}]   ;;  %s1799_s6 = inlined_call_operand.vmem [shape: f32[8,1], index: 6, kind: input, shape index: {}]   ;;  %s1800_s7 = inlined_call_operand.hbm [shape: f32[8,512], index: 7, kind: output, shape index: {}]  }
   0x1   :  { %14 = vsyncpa [#allocation3 + $0x1], 0 }
   0x2   :  { %15 = vsyncpa [#allocation4], 0 }
   0x3   :  { %17 = vsyncpa [#allocation4 + $0x1], 0  ;;  %s1162_s24 = smov 0   ;;  %s1164_s25 = smov 0  }
   0x4   :  { %s1166_s26 = smov 0   ;;  %s1168_s27 = smov 0  }
   0x5 LB: > { %s1183_s28 = sadd.s32 4294967295, %s1109_s27   ;;  %s809_s29 = sadd.s32 4294967294, %s1109_s27   ;;  %s1109_s27 = sphi %s1168_s27, %s1957_s27   ;;  %s1105_s26 = sphi %s1166_s26, %s1956_s26   ;;  %s1101_s25 = sphi %s1164_s25, %s1955_s25   ;;  %s1097_s24 = sphi %s1162_s24, %s1954_s24  }
   0x6   : > { %s1187_s30 = sadd.s32 1, %s1109_s27   ;;  %s30_s8 = sadd.s32 1, %s1105_s26 }
   0x7   : > { %s27_s9 = ssub.s32 %s1109_s27, %s1187_s30  ;;  %p37_p0 = scmp.ne.s32.totalorder %s1105_s26, %s1101_s25 }
   0x8   : > { %p28_p1 = scmp.eq.s32.totalorder %s27_s9, 0  ;;  %p38_p2 = scmp.eq.s32.totalorder %s1109_s27, 0 }
   0x9   : > { %p43_p3 = scmp.ne.s32.totalorder %s1101_s25, %s1097_s24  ;;  %p44_p4 = scmp.eq.s32.totalorder %s1183_s28, 0 }
   0xa   : > { %s1199_s10 = scalar_select %p28_p1, %s1105_s26, %s30_s8  }
   0xb   : > { %p1201_p5 = por %p38_p2, %p37_p0  ;;  %p1205_p6 = por %p44_p4, %p43_p3 }
   0xc   : > { %p193_p7 = scmp.eq.s32.totalorder %s1183_s28, 1  ;;  %p199_p8 = scmp.eq.s32.totalorder %s809_s29, 1 }
   0xd   : > { %p889_p10 = scmp.lt.s32.totalorder %s1109_s27, 2  ;;  %s237_s15 = sand.u32 1, %s1105_s26  }
   0xe   : > { %p1212_p11 = por %p193_p7, %p37_p0  ;;  %p1216_p12 = por %p199_p8, %p43_p3 }
   0xf   : > { %s875_s16 = sshll.u32 %s1109_s27, 8  ;;  %s812_s17 = sshll.u32 %s237_s15, 4 }
  0x10   : > { %s1828_s13 = scalar_select %p1212_p11, 1, 0 }
  0x11   : > { %s1829_s14 = scalar_select %p1216_p12, 1, 0 }
  0x12   : > { %s1225_s20 = scalar_lea.hbm %s1793_s0, %s875_s16  ;;  %s241_s21 = scalar_lea.vmem [#allocation2], %s812_s17 }
  0x13   : > { %s249_s22 = sshll.u32 %s241_s21, 4  ;;  %p1229_p13 = pnand %p889_p10, %p1201_p5  ;;  %s1233_s22 = int_to_ptr.vmem [resolvable:$true] %s249_s22 }
  0x14   : > { %s238_s29 = scalar_lea.sflag [#allocation3], %s237_s15  ;;  %s1013_s8 = scalar_lea.hbm %s1225_s20, 256 }
  0x15   : > { %p1014_p2 = scmp.ne.s32.totalorder %s1225_s20, %s1013_s8  ;;  %p1015_p3 = pneg %p1229_p13 }
  0x16   : > { %s1018_s16 = scalar_lea.hbm %s1793_s0, 512  ;;  %p1019_p5 = scmp.lt.u32.totalorder %s1225_s20, %s1793_s0 }
  0x17   : > { %p1016_p4 = pnand %p1015_p3, %p1014_p2  ;;  %p1020_p8 = scmp.lt.u32.totalorder %s1018_s16, %s1013_s8 }
  0x18   : > { %p1022_p9 = scmp.lt.u32.totalorder %s1013_s8, %s1225_s20 }
  0x19   : > { %p1017_p7 = pneg %p1016_p4  ;;  %p1021_p10 = por %p1020_p8, %p1019_p5 }
  0x1b   : > { %p1023_p0 = por %p1022_p9, %p1021_p10 }
  0x1d   : > { %p1024_p1 = pnand %p1023_p0, %p1017_p7 }
  0x1f   : > { %1027 = shalt.err (!%p1024_p1)
}
  0x20   : > { %s1028_s15 = scalar_lea.vmem %s1233_s22, 256  ;;  %s1111_s19 = smov [#allocation2]  }
  0x21   : > { %p1029_p2 = scmp.ne.s32.totalorder %s1233_s22, %s1028_s15  ;;  %s1033_s21 = sshll.u32 %s1111_s19, 4  ;;  %s1034_s21 = int_to_ptr.vmem [resolvable:$false] %s1033_s21 }
  0x22   : > { %s1035_s9 = scalar_lea.vmem %s1034_s21, 512  ;;  %p1036_p11 = scmp.lt.s32.totalorder %s1233_s22, %s1034_s21 }
  0x23   : > { %p1031_p4 = pnand %p1029_p2, %p1015_p3  ;;  %p1037_p5 = scmp.lt.s32.totalorder %s1035_s9, %s1028_s15 }
  0x25   : > { %p1032_p12 = pneg %p1031_p4  ;;  %p1038_p8 = por %p1037_p5, %p1036_p11 }
  0x27   : > { %p1039_p9 = pnand %p1038_p8, %p1032_p12 }
  0x29   : > { %1042 = shalt.err (!%p1039_p9)
}
  0x2a   : > { %884 = dma.hbm_to_vmem [thread:$0]  (!%p1229_p13), %s1225_s20, 256, %s1233_s22, %s238_s29  }
  0x2b   : > { %p1831_p0 = scmp.lt.s32.totalorder %s1109_s27, 3  ;;  %p1832_p1 = scmp.ge.s32.totalorder %s1109_s27, 1 }
  0x2d   : > { %p255_p3 = pnand %p1832_p1, %p1831_p0 }
  0x2e   : > { %s1267_s8 = sand.u32 (!%p255_p3), 1, %s1101_s25  }
  0x2f   : > { %258 = sbr.rel (%p255_p3) target bundleno = 798 (0x31e), region = 48  ;;  %s1802_s11 = sshll.u32 (!%p255_p3), %s1267_s8, 4 }
  0x30   : > { %s261_s16 = scalar_lea.sflag (!%p255_p3), [#allocation3], %s1267_s8  ;;  %s264_s23 = scalar_lea.vmem (!%p255_p3), [#allocation2], %s1802_s11 }
  0x36   : > { %1088 = dma.done.wait (%p1205_p6), %s261_s16, 256  }
  0x37   : > { %1090 = vsyncadd (%p1205_p6), %s261_s16, 4294967040  ;;  %v1112_v0 = vmov 0   ;;  %v1280_v1 = vld [vmem:[%s264_s23] sm:$0xff]  ;;  %v1282_v2 = vld [vmem:[%s264_s23 + $0x8] sm:$0xff]  ;;  %s1113_s20 = smov 15   ;;  %s1114_s22 = smov 17   ;;  %v312_v12 = vlaneseq }
  0x38   : > { %574 = vmatprep.mubr.bf16.mxu0 %v1112_v0  ;;  %972 = vset.pattern.permute.xlu0 %v1112_v0  ;;  %v942_v3 = vpack.i.bf16 %v1282_v2, %v1280_v1  ;;  %s1803_s12 = smov 1   ;;  %s1116_s29 = smov 16   ;;  %v525_v4 = vld [vmem:[%s1797_s4] sm:$0xff]  ;;  %v1848_v39 = vmov 0  ;;  %v1850_v40 = vmov 0  ;;  %v1857_v45 = vmov 0 }
  0x39   : > { %709 = vmatprep.mubr.bf16.mxu1 %v1112_v0  ;;  %s1117_s17 = smov 127   ;;  %s1118_s18 = smov 113   ;;  %v300_v5 = vld [vmem:[%s1794_s1] sm:$0x3]  ;;  %v313_v16 = vshrl.u32 %v312_v12, 7  ;;  %v1362_v20 = vand.u32 127, %v312_v12 }
  0x3a   : > { %943 = vrot.lane.b32.xlu1 %v942_v3, %s1113_s20  ;;  %933 = vrot.lane.b32.xlu0 %v942_v3, %s1114_s22  ;;  %s1119_s15 = smov 112   ;;  %s1120_s19 = smov 111   ;;  %v1303_v6 = vld [vmem:[%s1795_s2] sm:$0x3]  ;;  %v302_v7 = vadd.s32 4294967295, %v300_v5  ;;  %vm353_vm2 = vcmp.ge.s32.totalorder %v300_v5, 0 }
  0x3b   : > { %v1306_v8 = vadd.s32 4294967295, %v1303_v6  ;;  %v337_v9 = vadd.s32 1, %v1303_v6  ;;  %vm354_vm3 = vcmp.lt.s32.totalorder %v300_v5, 16  ;;  %vm1805_vm6 = vcmp.ge.s32.totalorder %v1303_v6, 0  ;;  %s1911_s21 = smov 1   ;;  %p1951_p11 = scmp.ne.s32.totalorder %s1828_s13, 0 }
  0x3c   : > { %vm303_vm0 = vcmp.ge.s32.totalorder %v302_v7, 0  ;;  %vm304_vm1 = vcmp.lt.s32.totalorder %v302_v7, 16  ;;  %vm1311_vm8 = vmand %vm353_vm2, %vm354_vm3  ;;  %vm324_vm12 = vcmp.lt.s32.totalorder %v1303_v6, 16  ;;  %v395_v15 = vadd.s32 1, %v300_v5 }
  0x3d   : > { %vm305_vm4 = vmand %vm303_vm0, %vm304_vm1  ;;  %vm1804_vm5 = vcmp.ge.s32.totalorder %v1306_v8, 0  ;;  %vm338_vm7 = vcmp.ge.s32.totalorder %v337_v9, 0  ;;  %vm309_vm10 = vcmp.lt.s32.totalorder %v1306_v8, 16  ;;  %vm340_vm14 = vcmp.lt.s32.totalorder %v337_v9, 16 }
  0x3e   : > { %948 = vrot.lane.b32.xlu1 %v942_v3, %s1803_s12  ;;  %938 = vrot.lane.b32.xlu0 %v942_v3, %s1116_s29  ;;  %vm308_vm9 = vmand %vm305_vm4, %vm1804_vm5  ;;  %v1352_v17 = vsub.s32 1, %v313_v16  ;;  %v1354_v18 = vsub.s32 0, %v313_v16  ;;  %v1861_v53 = vmov 0  ;;  %v1863_v54 = vmov 0 }
  0x3f   : > { %vm323_vm11 = vmand %vm305_vm4, %vm1805_vm6  ;;  %v1873_v61 = vmov 0  ;;  %v1875_v7 = vmov 0 }
  0x40   : > { %vm339_vm13 = vmand %vm305_vm4, %vm338_vm7 }
  0x41   : > { %vm1324_vm15 = vmand %vm308_vm9, %vm309_vm10 }
  0x42   : > { %953 = vrot.lane.b32.xlu0 %v942_v3, %s1117_s17  ;;  %958 = vrot.lane.b32.xlu1 %v942_v3, %s1118_s18  ;;  %vm1330_vm0 = vmand %vm323_vm11, %vm324_vm12  ;;  %vm396_vm11 = vcmp.ge.s32.totalorder %v395_v15, 0  ;;  %v311_v19 = vsel %vm1324_vm15, 1, %v1112_v0 }
  0x43   : > { %vm1335_vm1 = vmand %vm339_vm13, %vm340_vm14  ;;  %vm397_vm13 = vcmp.lt.s32.totalorder %v395_v15, 16  ;;  %v326_v21 = vsel %vm1330_vm0, 1, %v1112_v0  ;;  %v319_v23 = vrot.slane %v311_v19, %v1352_v17  ;;  %v315_v24 = vrot.slane %v311_v19, %v1354_v18 }
  0x44   : > { %vm356_vm2 = vmand %vm1311_vm8, %vm1804_vm5  ;;  %v342_v25 = vsel %vm1335_vm1, 1, %v1112_v0  ;;  %v334_v27 = vrot.slane %v326_v21, %v1352_v17  ;;  %v330_v28 = vrot.slane %v326_v21, %v1354_v18 }
  0x45   : > { %vm369_vm3 = vmand %vm1311_vm8, %vm1805_vm6  ;;  %v350_v32 = vrot.slane %v342_v25, %v1352_v17  ;;  %v346_v34 = vrot.slane %v342_v25, %v1354_v18 }
  0x46   : > { %963 = vrot.lane.b32.xlu0 %v942_v3, %s1119_s15  ;;  %968 = vrot.lane.b32.xlu1 %v942_v3, %s1120_s19  ;;  %vm382_vm4 = vmand %vm1311_vm8, %vm338_vm7 }
  0x47   : > { %vm357_vm9 = vmand %vm356_vm2, %vm309_vm10 }
  0x48   : > { %vm370_vm5 = vmand %vm369_vm3, %vm324_vm12  ;;  %v358_v26 = vsel %vm357_vm9, 1, %v1112_v0  ;;  %vm1412_vm9 = vcmp.eq.s32.totalorder %v315_v24, 1 }
  0x49   : > { %vm383_vm6 = vmand %vm382_vm4, %vm340_vm14  ;;  %v371_v29 = vsel %vm370_vm5, 1, %v1112_v0  ;;  %v366_v33 = vrot.slane %v358_v26, %v1352_v17  ;;  %v362_v35 = vrot.slane %v358_v26, %v1354_v18  ;;  %vm1845_vm5 = vcmp.ge.s32.totalorder %v1306_v8, 0 }
  0x4a   : > { %528 = vperm.xlu0 %972, %v525_v4   ;;  %vm1367_vm8 = vmand %vm396_vm11, %vm397_vm13  ;;  %v1384_v30 = vsel %vm383_vm6, 1, %v1112_v0  ;;  %v1851_v40 = vsel %vm1412_vm9, 4294967295, %v1850_v40  ;;  %v379_v41 = vrot.slane %v371_v29, %v1352_v17  ;;  %vm1852_vm11 = vcmp.ge.s32.totalorder %v1303_v6, 0 }
  0x4b   : > { %vm425_vm2 = vmand %vm1367_vm8, %vm338_vm7  ;;  %vm1807_vm7 = vcmp.lt.s32.totalorder %v1362_v20, 15  ;;  %v392_v42 = vrot.slane %v1384_v30, %v1352_v17  ;;  %v375_v47 = vrot.slane %v371_v29, %v1354_v18  ;;  %vm1458_vm4 = vcmp.eq.s32.totalorder %v346_v34, 1 }
  0x4c   : > { %vm1391_vm1 = vmand %vm425_vm2, %vm340_vm14  ;;  %vm1407_vm14 = vcmp.eq.s32.totalorder %v319_v23, 1  ;;  %vm1427_vm2 = vcmp.eq.s32.totalorder %v334_v27, 1  ;;  %vm1462_vm3 = vcmp.eq.s32.totalorder %v362_v35, 1  ;;  %vm1475_vm15 = vcmp.eq.s32.totalorder %v379_v41, 1 }
  0x4d   : > { %vm1403_vm6 = vmand %vm1367_vm8, %vm1845_vm5  ;;  %v1849_v39 = vsel %vm1407_vm14, 4294967295, %v1848_v39  ;;  %vm1431_vm5 = vcmp.eq.s32.totalorder %v330_v28, 1  ;;  %v1439_v46 = vsel %vm1391_vm1, 1, %v1112_v0  ;;  %vm1454_vm1 = vcmp.eq.s32.totalorder %v366_v33, 1 }
  0x4e   : > { %vm1423_vm13 = vmand %vm1367_vm8, %vm1852_vm11  ;;  %v1858_v45 = vsel %vm1431_vm5, 4294967295, %v1857_v45  ;;  %vm1450_vm11 = vcmp.eq.s32.totalorder %v350_v32, 1  ;;  %v1864_v54 = vsel %vm1454_vm1, 4294967295, %v1863_v54  ;;  %vm1479_vm0 = vcmp.eq.s32.totalorder %v392_v42, 1 }
  0x4f   : > { %vm1446_vm8 = vmand %vm1403_vm6, %vm309_vm10  ;;  %v1862_v53 = vsel %vm1450_vm11, 4294967295, %v1861_v53  ;;  %v1874_v61 = vsel %vm1479_vm0, 4294967295, %v1873_v61  ;;  %v435_v62 = vrot.slane %v1439_v46, %v1352_v17  ;;  %v388_v63 = vrot.slane %v1384_v30, %v1354_v18 }
  0x50   : > { %vm1470_vm10 = vmand %vm1423_vm13, %vm324_vm12  ;;  %vm1488_vm13 = vcmp.eq.s32.totalorder %v375_v47, 1  ;;  %vm1877_vm6 = vcmp.lt.s32.totalorder %v1362_v20, 17  ;;  %v401_v10 = vsel %vm1446_vm8, 1, %v1112_v0  ;;  %vm1878_vm12 = vcmp.lt.s32.totalorder %v1362_v20, 1 }
  0x51   : > { %v1876_v7 = vsel %vm1488_vm13, 4294967295, %v1875_v7  ;;  %v414_v11 = vsel %vm1470_vm10, 1, %v1112_v0  ;;  %vm1879_vm0 = vcmp.lt.s32.totalorder %v1362_v20, 16  ;;  %vm1881_vm13 = vcmp.lt.s32.totalorder %v1362_v20, 15  ;;  %vm1882_vm10 = vmmov %vm1878_vm12 }
  0x52   : > { %vm1880_vm8 = vmmov %vm1879_vm0  ;;  %v409_v29 = vrot.slane %v401_v10, %v1352_v17  ;;  %v422_v30 = vrot.slane %v414_v11, %v1352_v17  ;;  %v431_v31 = vrot.slane %v1439_v46, %v1354_v18  ;;  %v405_v34 = vrot.slane %v401_v10, %v1354_v18 }
  0x53   : > { %v418_v17 = vrot.slane %v414_v11, %v1354_v18 }
  0xac   : > { %v944_v37 = vpop.permute.xlu1 %943  ;;  %v934_v38 = vpop.permute.xlu0 %933 }
  0xad   : > { %v946_v48 = vunpack.i.h.bf16 %v944_v37  ;;  %v945_v49 = vunpack.i.l.bf16 %v944_v37  ;;  %v936_v50 = vunpack.i.h.bf16 %v934_v38  ;;  %v935_v51 = vunpack.i.l.bf16 %v934_v38 }
  0xaf   : > { %v463_v8 = vsel %vm1807_vm7, %v945_v49, %v946_v48  ;;  %v445_v9 = vsel %vm1877_vm6, %v935_v51, %v936_v50  ;;  %vm1811_vm7 = vmpackc.low %vm1427_vm2, %vm1407_vm14  ;;  %v446_v14 = vsel %vm1877_vm6, %v936_v50, %v935_v51  ;;  %v464_v0 = vsel %vm1881_vm13, %v946_v48, %v945_v49 }
  0xb0   : > { %v949_v58 = vpop.permute.xlu1 %948  ;;  %v939_v59 = vpop.permute.xlu0 %938  ;;  %vm1883_vm13 = vcmp.lt.s32.totalorder %v1362_v20, 127  ;;  %vm1542_vm6 = vcmp.eq.s32.totalorder %v388_v63, 1  ;;  %v1889_v48 = vmov 0  ;;  %v1891_v49 = vmov 0 }
  0xb1   : > { %v951_v3 = vunpack.i.h.bf16 %v949_v58  ;;  %v950_v4 = vunpack.i.l.bf16 %v949_v58  ;;  %v941_v5 = vunpack.i.h.bf16 %v939_v59  ;;  %v940_v6 = vunpack.i.l.bf16 %v939_v59 }
  0xb2   : > { %v1893_v50 = vmov 0  ;;  %v1895_v51 = vmov 0  ;;  %vm1908_vm14 = vcmp.lt.s32.totalorder %v1362_v20, 112 }
  0xb3   : > { %v472_v12 = vsel %vm1878_vm12, %v950_v4, %v951_v3  ;;  %v454_v13 = vsel %vm1879_vm0, %v940_v6, %v941_v5  ;;  %v455_v15 = vsel %vm1880_vm8, %v941_v5, %v940_v6  ;;  %v473_v16 = vsel %vm1882_vm10, %v951_v3, %v950_v4  ;;  %vm1809_vm0 = vmpackc.low %vm1431_vm5, %vm1412_vm9 }
  0xb4   : > { %v819_v19 = vpack.c.bf16 %v454_v13, %v445_v9  ;;  %v954_v21 = vpop.permute.xlu0 %953  ;;  %v822_v22 = vpack.c.bf16 %v455_v15, %v446_v14  ;;  %v959_v23 = vpop.permute.xlu1 %958  ;;  %vm1810_vm12 = vmpackc.low %vm1454_vm1, %vm1450_vm11  ;;  %v825_v28 = vpack.c.bf16 %v472_v12, %v463_v8  ;;  %v828_v35 = vpack.c.bf16 %v473_v16, %v464_v0  ;;  %v524_v13 = vld [vmem:[%s1796_s3] sm:$0xf] }
  0xb5   : > { %v956_v24 = vunpack.i.h.bf16 %v954_v21  ;;  %v955_v25 = vunpack.i.l.bf16 %v954_v21  ;;  %v961_v26 = vunpack.i.h.bf16 %v959_v23  ;;  %v960_v27 = vunpack.i.l.bf16 %v959_v23  ;;  %vm1886_vm8 = vmmov %vm1883_vm13 }
  0xb6   : > { %820 = vmatprep.subr.msk.bf16.mxu0 %vm1811_vm7, %v819_v19  ;;  %vm1887_vm10 = vcmp.lt.s32.totalorder %v1362_v20, 113  ;;  %vm1574_vm7 = vcmp.eq.s32.totalorder %v422_v30, 1  ;;  %vm1898_vm11 = vmpackc.low %vm1462_vm3, %vm1458_vm4  ;;  %vm1899_vm1 = vcmp.lt.s32.totalorder %v1362_v20, 111  ;;  %v1903_v3 = vmov 0 }
  0xb7   : > { %v484_v32 = vsel %vm1883_vm13, %v956_v24, %v955_v25  ;;  %823 = vmatpush1.bf16.msk.msra.mxu0 %vm1809_vm0, %v822_v22  ;;  %v483_v36 = vsel %vm1886_vm8, %v955_v25, %v956_v24  ;;  %v493_v38 = vsel %vm1887_vm10, %v961_v26, %v960_v27  ;;  %vm1888_vm8 = vnez %v1874_v61  ;;  %vm1900_vm9 = vmmov %vm1899_vm1 }
  0xb8   : > { %v831_v37 = vpack.c.bf16 %v484_v32, %v1282_v2  ;;  %826 = vmatprep.subr.msk.bf16.mxu0 %vm1810_vm12, %v825_v28  ;;  %v964_v41 = vpop.permute.xlu0 %963  ;;  %v969_v18 = vpop.permute.xlu1 %968  ;;  %vm1566_vm12 = vcmp.eq.s32.totalorder %v435_v62, 1  ;;  %vm1570_vm10 = vcmp.eq.s32.totalorder %v409_v29, 1  ;;  %v1894_v50 = vsel %vm1574_vm7, 4294967295, %v1893_v50  ;;  %vm1901_vm5 = vmpackc.low %vm1888_vm8, %vm1475_vm15 }
  0xb9   : > { %v966_v42 = vunpack.i.h.bf16 %v964_v41  ;;  %v965_v43 = vunpack.i.l.bf16 %v964_v41  ;;  %v971_v46 = vunpack.i.h.bf16 %v969_v18  ;;  %v970_v47 = vunpack.i.l.bf16 %v969_v18 }
  0xba   : > { %v1890_v48 = vsel %vm1566_vm12, 4294967295, %v1889_v48  ;;  %v1892_v49 = vsel %vm1570_vm10, 4294967295, %v1891_v49  ;;  %vm1578_vm13 = vcmp.eq.s32.totalorder %v431_v31, 1  ;;  %v834_v52 = vpack.c.bf16 %v483_v36, %v1280_v1 }
  0xbb   : > { %v1896_v51 = vsel %vm1578_vm13, 4294967295, %v1895_v51  ;;  %vm1897_vm0 = vcmp.lt.s32.totalorder %v1362_v20, 112  ;;  %829 = vmatpush1.bf16.msk.msra.mxu0 %vm1898_vm11, %v828_v35  ;;  %v511_v58 = vsel %vm1899_vm1, %v971_v46, %v970_v47  ;;  %v510_v59 = vsel %vm1900_vm9, %v970_v47, %v971_v46 }
  0xbc   : > { %v502_v57 = vsel %vm1897_vm0, %v966_v42, %v965_v43  ;;  %832 = vmatprep.subr.msk.bf16.mxu0 %vm1901_vm5, %v831_v37  ;;  %vm1902_vm0 = vnez %v1876_v7  ;;  %v513_v63 = vsel %vm1566_vm12, %v511_v58, 0.0  ;;  %vm1609_vm11 = vcmp.eq.s32.totalorder %v405_v34, 1  ;;  %vm1910_vm12 = vmpackc.low %vm1574_vm7, %vm1570_vm10 }
  0xbd   : > { %v837_v62 = vpack.c.bf16 %v502_v57, %v493_v38  ;;  %v1904_v3 = vsel %vm1609_vm11, 4294967295, %v1903_v3  ;;  %vm1613_vm1 = vcmp.eq.s32.totalorder %v418_v17, 1  ;;  %v1905_v4 = vmov 0  ;;  %vm1909_vm9 = vmpackc.low %vm1542_vm6, %vm1902_vm0 }
  0xbe   : > { %v1906_v4 = vsel %vm1613_vm1, 4294967295, %v1905_v4  ;;  %v512_v5 = vsel %vm1578_vm13, %v510_v59, 0.0  ;;  %vm1907_vm5 = vcmp.lt.s32.totalorder %v1362_v20, 113  ;;  %v501_v8 = vsel %vm1908_vm14, %v965_v43, %v966_v42 }
  0xbf   : > { %v492_v6 = vsel %vm1907_vm5, %v960_v27, %v961_v26  ;;  %835 = vmatpush1.bf16.msk.msra.mxu0 %vm1909_vm9, %v834_v52  ;;  %vm1820_vm5 = vmpackc.low %vm1613_vm1, %vm1609_vm11  ;;  %v523_v9 = vpack.c.bf16 %v513_v63, %v513_v63  ;;  %v522_v10 = vpack.c.bf16 %v512_v5, %v512_v5  ;;  %vm1819_vm14 = vcmask 1043456   ;;  %v662_v26 = vld [vmem:[%s1799_s6] sm:$0xff] }
  0xc0   : > { %838 = vmatprep.subr.msk.bf16.mxu0 %vm1910_vm12, %v837_v62  ;;  %v840_v11 = vpack.c.bf16 %v501_v8, %v492_v6  ;;  %vm1818_vm12 = vcmask 588800   ;;  %vm1912_vm9 = vcmp.lt.s32.totalorder %v1362_v20, 17  ;;  %vm1916_vm11 = vcmp.lt.s32.totalorder %v1362_v20, 15 }
  0xc1   : > { %v537_v12 = vsel %vm1819_vm14, %v522_v10, 0  ;;  %vm1921_vm1 = vcmp.lt.s32.totalorder %v1362_v20, 1  ;;  %vm1924_vm10 = vnez %v1851_v40 }
  0xc2   : > { %vm1922_vm13 = vmmov %vm1921_vm1 }
  0xc3   : > { %841 = vmatpush1.bf16.msk.msra.mxu0 %vm1820_vm5, %v840_v11 }
  0xc4   : > { %842 = vmatprep.subr.msk.bf16.mxu0 %vm1819_vm14, %v523_v9  ;;  %vm1914_vm14 = vcmp.lt.s32.totalorder %v1362_v20, 16 }
  0xc5   : > { %vm1915_vm5 = vmmov %vm1914_vm14 }
  0xc7   : > { %551 = vmatpush1.bf16.msra.mxu0 %v537_v12 }
  0xc9   : > { %v529_v14 = vpop.permute.xlu0 %528 }
  0xca   : > { %843 = vmatmul.mubr.msk.bf16.vlgmr.msra.gmra.mrb[0].mxu0 %vm1818_vm12, %v524_v13  ;;  %vm1913_vm12 = vmmov %vm1912_vm9 }
 0x19d   : > { %v576_v15 = vpop.f32.mrb[0].mxu0 }
 0x19e   : > { %v577_v0 = vadd.f32 %v576_v15, %v529_v14  ;;  %v578_v16 = vpop.f32.mrb[1].mxu0 }
 0x19f   : > { %v579_v19 = vadd.f32 %v578_v16, %v529_v14  ;;  %v580_v21 = vpop.f32.mrb[2].mxu0 }
 0x1a0   : > { %v583_v22 = vmax.f32 %v577_v0, 0.0  ;;  %v581_v23 = vpop.f32.mrb[3].mxu0 }
 0x1a1   : > { %v584_v24 = vmax.f32 %v579_v19, 0.0 }
 0x1a3   : > { %v983_v25 = vpack.i.bf16 %v584_v24, %v583_v22 }
 0x1a5   : > { %984 = vrot.lane.b32.xlu0 %v983_v25, %s1113_s20  ;;  %974 = vrot.lane.b32.xlu1 %v983_v25, %s1114_s22 }
 0x1a9   : > { %994 = vrot.lane.b32.xlu0 %v983_v25, %s1117_s17  ;;  %979 = vrot.lane.b32.xlu1 %v983_v25, %s1116_s29  ;;  %s876_s29 = sshll.u32 %s1183_s28, 8  ;;  %s1950_s17 = sshll.u32 %s1267_s8, 4 }
 0x1aa   : > { %s1749_s11 = scalar_lea.hbm %s1800_s7, %s876_s29  ;;  %s725_s28 = scalar_lea.sflag [#allocation4], %s1267_s8 }
 0x1ad   : > { %1004 = vrot.lane.b32.xlu0 %v983_v25, %s1119_s15  ;;  %989 = vrot.lane.b32.xlu1 %v983_v25, %s1911_s21  ;;  %s1121_s21 = smov [#allocation5]  }
 0x1ae   : > { %s1047_s9 = sshll.u32 %s1121_s21, 4  ;;  %s1048_s9 = int_to_ptr.vmem [resolvable:$false] %s1047_s9 }
 0x1af   : > { %s1049_s16 = scalar_lea.vmem %s1048_s9, 512 }
 0x1b1   : > { %665 = vperm.xlu0 %972, %v662_v26   ;;  %999 = vrot.lane.b32.xlu1 %v983_v25, %s1118_s18  ;;  %s294_s18 = scalar_lea.vmem [#allocation5], %s1950_s17 }
 0x1b2   : > { %s739_s15 = sshll.u32 %s294_s18, 4  ;;  %s1751_s15 = int_to_ptr.vmem [resolvable:$true] %s739_s15 }
 0x1b3   : > { %s1043_s12 = scalar_lea.vmem %s1751_s15, 256  ;;  %p1050_p7 = scmp.lt.s32.totalorder %s1751_s15, %s1048_s9 }
 0x1b4   : > { %p1044_p6 = scmp.ne.s32.totalorder %s1751_s15, %s1043_s12  ;;  %p1051_p10 = scmp.lt.s32.totalorder %s1049_s16, %s1043_s12 }
 0x1b5   : > { %1009 = vrot.lane.b32.xlu1 %v983_v25, %s1120_s19 }
 0x1b6   : > { %p1045_p12 = pnand %p1044_p6, %p1951_p11  ;;  %p1052_p2 = por %p1051_p10, %p1050_p7 }
 0x1b8   : > { %p1046_p13 = pneg %p1045_p12 }
 0x1ba   : > { %p1053_p4 = pnand %p1052_p2, %p1046_p13 }
 0x217   : > { %v985_v27 = vpop.permute.xlu0 %984  ;;  %v975_v28 = vpop.permute.xlu1 %974 }
 0x218   : > { %v977_v29 = vunpack.i.h.bf16 %v975_v28  ;;  %v976_v30 = vunpack.i.l.bf16 %v975_v28  ;;  %v987_v35 = vunpack.i.h.bf16 %v985_v27  ;;  %v986_v36 = vunpack.i.l.bf16 %v985_v27 }
 0x21a   : > { %v589_v37 = vsel %vm1912_vm9, %v976_v30, %v977_v29  ;;  %v590_v38 = vsel %vm1913_vm12, %v977_v29, %v976_v30  ;;  %v605_v59 = vsel %vm1916_vm11, %v986_v36, %v987_v35  ;;  %vm1917_vm12 = vnez %v1849_v39 }
 0x21b   : > { %v995_v31 = vpop.permute.xlu0 %994  ;;  %v980_v32 = vpop.permute.xlu1 %979  ;;  %vm1918_vm9 = vmpackc.low %vm1427_vm2, %vm1917_vm12 }
 0x21c   : > { %v982_v34 = vunpack.i.h.bf16 %v980_v32  ;;  %v981_v17 = vunpack.i.l.bf16 %v980_v32  ;;  %v997_v41 = vunpack.i.h.bf16 %v995_v31  ;;  %v996_v18 = vunpack.i.l.bf16 %v995_v31 }
 0x21e   : > { %v597_v42 = vsel %vm1914_vm14, %v981_v17, %v982_v34  ;;  %v598_v43 = vsel %vm1915_vm5, %v982_v34, %v981_v17  ;;  %vm1919_vm14 = vmmov %vm1916_vm11  ;;  %vm1920_vm5 = vcmp.lt.s32.totalorder %v1362_v20, 127  ;;  %vm1923_vm11 = vnez %v1858_v45 }
 0x21f   : > { %v990_v46 = vpop.permute.xlu1 %989  ;;  %v845_v47 = vpack.c.bf16 %v597_v42, %v589_v37  ;;  %v848_v52 = vpack.c.bf16 %v598_v43, %v590_v38  ;;  %v1005_v62 = vpop.permute.xlu0 %1004  ;;  %v606_v63 = vsel %vm1919_vm14, %v987_v35, %v986_v36  ;;  %v624_v5 = vsel %vm1920_vm5, %v997_v41, %v996_v18  ;;  %vm1925_vm7 = vmpackc.low %vm1923_vm11, %vm1924_vm10 }
 0x220   : > { %v992_v57 = vunpack.i.h.bf16 %v990_v46  ;;  %v991_v58 = vunpack.i.l.bf16 %v990_v46  ;;  %v1007_v10 = vunpack.i.h.bf16 %v1005_v62  ;;  %v1006_v11 = vunpack.i.l.bf16 %v1005_v62  ;;  %vm1926_vm2 = vmmov %vm1920_vm5 }
 0x221   : > { %846 = vmatprep.subr.msk.bf16.mxu1 %vm1918_vm9, %v845_v47  ;;  %v623_v14 = vsel %vm1926_vm2, %v996_v18, %v997_v41  ;;  %v857_v15 = vpack.c.bf16 %v624_v5, %v584_v24  ;;  %vm1930_vm10 = vcmp.lt.s32.totalorder %v1362_v20, 113  ;;  %vm1932_vm9 = vmpackc.low %vm1888_vm8, %vm1475_vm15  ;;  %vm1933_vm14 = vcmp.lt.s32.totalorder %v1362_v20, 112 }
 0x222   : > { %v613_v6 = vsel %vm1921_vm1, %v991_v58, %v992_v57  ;;  %v614_v8 = vsel %vm1922_vm13, %v992_v57, %v991_v58  ;;  %849 = vmatpush1.bf16.msk.msra.mxu1 %vm1925_vm7, %v848_v52  ;;  %vm1927_vm1 = vnez %v1864_v54  ;;  %vm1928_vm13 = vnez %v1862_v53  ;;  %vm1931_vm7 = vmpackc.low %vm1462_vm3, %vm1458_vm4 }
 0x223   : > { %v851_v39 = vpack.c.bf16 %v613_v6, %v605_v59  ;;  %v854_v44 = vpack.c.bf16 %v614_v8, %v606_v63  ;;  %v1000_v9 = vpop.permute.xlu1 %999  ;;  %vm1929_vm12 = vmpackc.low %vm1927_vm1, %vm1928_vm13  ;;  %v860_v54 = vpack.c.bf16 %v623_v14, %v583_v22  ;;  %v640_v53 = vsel %vm1933_vm14, %v1007_v10, %v1006_v11 }
 0x224   : > { %v1002_v12 = vunpack.i.h.bf16 %v1000_v9  ;;  %v1001_v13 = vunpack.i.l.bf16 %v1000_v9  ;;  %vm1934_vm5 = vmmov %vm1930_vm10  ;;  %vm1935_vm3 = vcmp.lt.s32.totalorder %v1362_v20, 111  ;;  %vm1939_vm11 = vnez %v1890_v48  ;;  %v661_v48 = vld [vmem:[%s1798_s5] sm:$0xf] }
 0x225   : > { %852 = vmatprep.subr.msk.bf16.mxu1 %vm1929_vm12, %v851_v39  ;;  %vm1936_vm4 = vmpackc.low %vm1542_vm6, %vm1902_vm0  ;;  %vm1940_vm2 = vnez %v1894_v50  ;;  %vm1941_vm1 = vnez %v1892_v49  ;;  %vm1943_vm12 = vnez %v1896_v51  ;;  %vm1944_vm6 = vnez %v1906_v4 }
 0x226   : > { %v632_v40 = vsel %vm1930_vm10, %v1002_v12, %v1001_v13  ;;  %855 = vmatpush1.bf16.msk.msra.mxu1 %vm1931_vm7, %v854_v44  ;;  %v631_v56 = vsel %vm1934_vm5, %v1001_v13, %v1002_v12  ;;  %vm1937_vm15 = vmmov %vm1935_vm3  ;;  %vm1945_vm0 = vnez %v1904_v3  ;;  %vm1947_vm7 = vcmask 1043456  }
 0x227   : > { %v1010_v45 = vpop.permute.xlu1 %1009  ;;  %858 = vmatprep.subr.msk.bf16.mxu1 %vm1932_vm9, %v857_v15  ;;  %v863_v19 = vpack.c.bf16 %v640_v53, %v632_v40  ;;  %vm1938_vm8 = vmmov %vm1933_vm14  ;;  %vm1949_vm14 = vcmask 588800  }
 0x228   : > { %v1012_v0 = vunpack.i.h.bf16 %v1010_v45  ;;  %v1011_v16 = vunpack.i.l.bf16 %v1010_v45  ;;  %v639_v61 = vsel %vm1938_vm8, %v1006_v11, %v1007_v10  ;;  %vm1942_vm13 = vmpackc.low %vm1940_vm2, %vm1941_vm1 }
 0x229   : > { %v866_v33 = vpack.c.bf16 %v639_v61, %v631_v56  ;;  %vm1946_vm10 = vmpackc.low %vm1944_vm6, %vm1945_vm0 }
 0x22a   : > { %v648_v55 = vsel %vm1935_vm3, %v1012_v0, %v1011_v16  ;;  %861 = vmatpush1.bf16.msk.msra.mxu1 %vm1936_vm4, %v860_v54  ;;  %v647_v60 = vsel %vm1937_vm15, %v1011_v16, %v1012_v0  ;;  %vm1948_vm9 = vmmov %vm1947_vm7 }
 0x22b   : > { %v650_v21 = vsel %vm1939_vm11, %v648_v55, 0.0  ;;  %864 = vmatprep.subr.msk.bf16.mxu1 %vm1942_vm13, %v863_v19  ;;  %v649_v7 = vsel %vm1943_vm12, %v647_v60, 0.0 }
 0x22c   : > { %v660_v22 = vpack.c.bf16 %v650_v21, %v650_v21  ;;  %v659_v23 = vpack.c.bf16 %v649_v7, %v649_v7 }
 0x22e   : > { %867 = vmatpush1.bf16.msk.msra.mxu1 %vm1946_vm10, %v866_v33  ;;  %v672_v20 = vsel %vm1948_vm9, %v659_v23, 0 }
 0x22f   : > { %868 = vmatprep.subr.msk.bf16.mxu1 %vm1947_vm7, %v660_v22 }
 0x230   : > { %v666_v49 = vpop.permute.xlu0 %665 }
 0x232   : > { %686 = vmatpush1.bf16.msra.mxu1 %v672_v20 }
 0x235   : > { %869 = vmatmul.mubr.msk.bf16.vlgmr.msra.gmra.mrb[0].mxu1 %vm1949_vm14, %v661_v48 }
 0x308   : > { %v711_v50 = vpop.f32.mrb[0].mxu1 }
 0x309   : > { %v712_v51 = vadd.f32 %v711_v50, %v666_v49  ;;  %v713_v4 = vpop.f32.mrb[1].mxu1 }
 0x30a   : > { %v714_v3 = vadd.f32 %v713_v4, %v666_v49  ;;  %v715_v24 = vpop.f32.mrb[2].mxu1 }
 0x30b   : > { %v718_v25 = vadd.f32 %v712_v51, %v1280_v1  ;;  %v716_v26 = vpop.f32.mrb[3].mxu1 }
 0x30c   : > { %v719_v27 = vadd.f32 %v714_v3, %v1282_v2 }
 0x30d   : > { %v720_v28 = vmax.f32 %v718_v25, 0.0 }
 0x30e   : > { %v721_v29 = vmax.f32 %v719_v27, 0.0 }
 0x30f   : > { %722 = vst [vmem:[%s294_s18] sm:$0xff] %v720_v28 }
 0x310   : > { %723 = vst [vmem:[%s294_s18 + $0x8] sm:$0xff] %v721_v29 }
 0x311   : > { %1056 = shalt.err (!%p1053_p4)
}
 0x312   : > { %s1057_s8 = scalar_lea.hbm %s1749_s11, 256  ;;  %s1061_s29 = scalar_lea.hbm %s1800_s7, 512 }
 0x313   : > { %p1058_p5 = scmp.ne.s32.totalorder %s1749_s11, %s1057_s8  ;;  %p1062_p0 = scmp.lt.u32.totalorder %s1749_s11, %s1800_s7 }
 0x314   : > { %p1063_p1 = scmp.lt.u32.totalorder %s1061_s29, %s1057_s8  ;;  %p1065_p6 = scmp.lt.u32.totalorder %s1057_s8, %s1749_s11 }
 0x315   : > { %p1059_p8 = pnand %p1058_p5, %p1951_p11 }
 0x316   : > { %p1064_p3 = por %p1063_p1, %p1062_p0 }
 0x317   : > { %p1060_p9 = pneg %p1059_p8 }
 0x318   : > { %p1066_p12 = por %p1065_p6, %p1064_p3 }
 0x31a   : > { %p1067_p13 = pnand %p1066_p12, %p1060_p9 }
 0x31c   : > { %1070 = shalt.err (!%p1067_p13)
}
 0x31d   : > { %879 = dma.vmem_to_hbm [thread:$0]  (%p1951_p11), %s1751_s15, 256, %s1749_s11, %s725_s28  }
 0x31e PF: > { %s751_s19 = sand.u32 1, %s1097_s24   ;;  %p1952_p7 = scmp.ne.s32.totalorder %s1829_s14, 0 }
 0x31f   : > { %p1953_p10 = scmp.ge.s32.totalorder %s1109_s27, 2  ;;  %s752_s23 = scalar_lea.sflag [#allocation4], %s751_s19 }
 0x321   : > { %p886_p2 = pnand %p1953_p10, %p1952_p7 }
 0x323   : > { %1092 = dma.done.wait (!%p886_p2), %s752_s23, 256  }
 0x324   : > { %1094 = vsyncadd (!%p886_p2), %s752_s23, 4294967040  ;;  %p20_p4 = scmp.ge.s32.totalorder %s1187_s30, 4   ;;  %s1954_s24 = smov %s1101_s25 }
 0x325   : > { %s1955_s25 = smov %s1105_s26  ;;  %s1956_s26 = smov %s1199_s10 }
 0x326   : > { %s1957_s27 = smov %s1187_s30  ;;  %22 = sbr.rel (!%p20_p4) target bundleno = 5 (0x5), region = 93 }
 0x32d   :  { %757 = vsyncpa [#allocation3], 1 }
 0x32e   :  { %759 = vsyncpa [#allocation3 + $0x1], 1 }
 0x32f   :  { %760 = vsyncpa [#allocation4], 1 }
 0x330   :  { %762 = vsyncpa [#allocation4 + $0x1], 1 }

</bundles_post_ra>
